<compile_context>
chip_gen: v6e
topology: v6e:2x2x1
jax: 0.10.0
libtpu: 0.0.40
codegen_flags: <defaults>
</compile_context>

<pallas_src>
import jax
import jax.numpy as jnp
from jax.experimental import pallas as pl
from jax.experimental.pallas import tpu as pltpu


# ----------------------------- kernel factories -------------------------------

def _make_sum_kernel(L):
    def kernel(*refs):
        x_refs, o_ref = refs[:L], refs[L]
        # Accumulate in f32 for floating inputs (better numerics, free on the
        # VPU), keep native dtype for integer inputs.
        acc_dtype = (jnp.float32
                     if jnp.issubdtype(o_ref.dtype, jnp.floating)
                     else o_ref.dtype)
        acc = x_refs[0][...].astype(acc_dtype)
        for r in x_refs[1:]:
            acc = acc + r[...].astype(acc_dtype)
        o_ref[...] = acc.astype(o_ref.dtype)
    return kernel


def _make_max_kernel(L):
    def kernel(*refs):
        x_refs, o_ref = refs[:L], refs[L]
        m = x_refs[0][...]            # init from first layer: no -inf fill,
        for r in x_refs[1:]:          # correct for integer dtypes too.
            m = jnp.maximum(m, r[...])
        o_ref[...] = m
    return kernel


def _make_concat_kernel(L, F, fuse_store):
    def kernel(*refs):
        x_refs, o_ref = refs[:L], refs[L]
        if fuse_store:
            # F is not lane-aligned: build the full (tile_n, L*F) block and do
            # ONE lane-dense store instead of L masked F-wide slab stores.
            o_ref[...] = jnp.concatenate([r[...] for r in x_refs], axis=-1)
        else:
            # F % 128 == 0: each slab store is already lane-aligned; skip the
            # XLU concat shuffle.
            for l in range(L):
                o_ref[:, l * F:(l + 1) * F] = x_refs[l][...]
    return kernel


# ----------------------------- tiling helpers ----------------------------------

def _round_up(x, m):
    return ((x + m - 1) // m) * m


def _vmem_budget():
    """(tiling budget, physical VMEM) in bytes, generation-aware."""
    try:
        cap = int(pltpu.get_tpu_info().vmem_capacity_bytes)
    except Exception:
        cap = 64 * 1024 * 1024          # conservative: v7x per-TC VMEM
    budget = min(24 * 1024 * 1024, cap // 3)
    return budget, cap


def _bytes_per_row(F, L, itemsize, mode, acc_extra):
    if mode == "C":
        # 2L double-buffered input tiles + 2 output tiles of width L*F
        # + one concatenated intermediate when the store is fused.
        return F * itemsize * (2 * L + 2 * L) + F * L * itemsize
    # 'S' / 'M': 2L input tiles + 2 output tiles of width F (+ f32 acc upcast).
    return F * (itemsize * (2 * L + 2) + acc_extra)


def _pick_tile_n(N, bytes_per_row, sub, budget):
    """Rows per grid step, sublane-aligned, >=2 grid steps when N allows."""
    tile = budget // max(1, bytes_per_row)
    if tile >= N:
        if N >= 2 * sub:
            # Keep at least 2 grid steps so the 'parallel' axis shards across
            # v7x's two TensorCores and prefetch/writeback overlaps compute.
            tile = _round_up(pl.cdiv(N, 2), sub)
        else:
            tile = N
    else:
        tile = max(sub, (tile // sub) * sub)
    return min(tile, N)


def _compiler_params(working_set_bytes, cap):
    limit = max(32 * 1024 * 1024, working_set_bytes + 4 * 1024 * 1024)
    limit = min(limit, cap - 2 * 1024 * 1024)
    return pltpu.CompilerParams(
        dimension_semantics=("parallel",),
        vmem_limit_bytes=int(limit))


# ----------------------------- wrapper ---------------------------------------

def jumping_knowledge(xs, mode):
    """Pallas implementation of JumpingKnowledge.forward.

    xs: list/tuple of arrays, each of shape (N, F), same dtype.
    """
    assert isinstance(xs, (list, tuple))
    assert mode in ["C", "S", "M", "L"]

    if mode == "L":
        # The result already exists as an array; any kernel here is pure waste.
        return xs[-1]

    L = len(xs)
    N, F = xs[0].shape
    dtype = xs[0].dtype
    itemsize = jnp.dtype(dtype).itemsize
    sub = max(8, 32 // itemsize)            # sublane packing: f32->8, bf16->16, i8->32
    budget, cap = _vmem_budget()

    if mode in ("S", "M"):
        # Elementwise over all positions: if F is not lane-aligned, relayout to
        # a lane-dense (R, 128) view (free contiguous reshape) so loads/stores
        # are unmasked. Never valid for 'C'.
        work_xs, Nw, Fw = list(xs), N, F
        if F % 128 != 0 and (N * F) % 128 == 0:
            Nw, Fw = (N * F) // 128, 128
            work_xs = [x.reshape(Nw, Fw) for x in xs]

        acc_extra = 4 if (mode == "S"
                          and jnp.issubdtype(dtype, jnp.floating)
                          and itemsize < 4) else 0
        bpr = _bytes_per_row(Fw, L, itemsize, mode, acc_extra)
        tile_n = _pick_tile_n(Nw, bpr, sub, budget)
        grid = (pl.cdiv(Nw, tile_n),)

        kernel = _make_sum_kernel(L) if mode == "S" else _make_max_kernel(L)
        out = pl.pallas_call(
            kernel,
            out_shape=jax.ShapeDtypeStruct((Nw, Fw), dtype),
            grid=grid,
            in_specs=[pl.BlockSpec((tile_n, Fw), lambda n: (n, 0))
                      for _ in range(L)],
            out_specs=pl.BlockSpec((tile_n, Fw), lambda n: (n, 0)),
            compiler_params=_compiler_params(tile_n * bpr, cap),
        )(*work_xs)
        return out.reshape(N, F) if (Nw, Fw) != (N, F) else out

    # mode == "C": one lane-dense (tile_n, L*F) output slab per grid step.
    fuse_store = (F % 128 != 0)
    bpr = _bytes_per_row(F, L, itemsize, "C", 0)
    tile_n = _pick_tile_n(N, bpr, sub, budget)
    grid = (pl.cdiv(N, tile_n),)

    return pl.pallas_call(
        _make_concat_kernel(L, F, fuse_store),
        out_shape=jax.ShapeDtypeStruct((N, L * F), dtype),
        grid=grid,
        in_specs=[pl.BlockSpec((tile_n, F), lambda n: (n, 0))
                  for _ in range(L)],
        out_specs=pl.BlockSpec((tile_n, L * F), lambda n: (n, 0)),
        compiler_params=_compiler_params(tile_n * bpr, cap),
    )(*xs)


# ----------------------------- demo / check ----------------------------------

if __name__ == "__main__":
    key = jax.random.PRNGKey(0)

    # Two small configs: lane-aligned F, and F=64 (exercises the (N,F)->(R,128)
    # relayout for S/M and the fused lane-dense store for C).
    configs = [
        (4, 8, 128, jnp.float32),
        (3, 32, 64, jnp.float32),
    ]

    ok = True
    for (L, N, F, dtype) in configs:
        key, sub = jax.random.split(key)
        keys = jax.random.split(sub, L)
        xs = [jax.random.normal(k, (N, F), dtype=dtype) for k in keys]

        # Pure-JAX references (mirror the PyTorch semantics exactly).
        ref = {
            "C": jnp.concatenate(xs, axis=-1),
            "S": sum(xs[1:], xs[0]),
            "M": jnp.max(jnp.stack(xs, axis=-1), axis=-1),
            "L": xs[-1],
        }

        for mode in ["C", "S", "M", "L"]:
            out = jax.block_until_ready(jumping_knowledge(xs, mode))
            assert out.shape == ref[mode].shape, (mode, out.shape, ref[mode].shape)
            assert out.dtype == ref[mode].dtype, (mode, out.dtype, ref[mode].dtype)
            if not jnp.allclose(out, ref[mode], atol=1e-6, rtol=1e-6):
                ok = False
                print(f"MISMATCH in mode {mode} (L={L}, N={N}, F={F})")

    if ok:
        print("KERNEL_OK")
</pallas_src>

<mosaic_0001>
module attributes {stable_mosaic.version = 11 : i64} {
  func.func @kernel(%arg0: i32, %arg1: memref<8x128xf32, #tpu.memory_space<vmem>>, %arg2: memref<8x128xf32, #tpu.memory_space<vmem>>, %arg3: memref<8x128xf32, #tpu.memory_space<vmem>>, %arg4: memref<8x128xf32, #tpu.memory_space<vmem>>, %arg5: memref<8x512xf32, #tpu.memory_space<vmem>>) attributes {dimension_semantics = [#tpu.dimension_semantics<parallel>], iteration_bounds = array<i64: 1>, scalar_prefetch = 0 : i64, scratch_operands = 0 : i64, tpu.core_type = #tpu.core_type<tc>, window_params = [{transform_indices = @transform_0, window_bounds = array<i64: 8, 128>}, {transform_indices = @transform_1, window_bounds = array<i64: 8, 128>}, {transform_indices = @transform_2, window_bounds = array<i64: 8, 128>}, {transform_indices = @transform_3, window_bounds = array<i64: 8, 128>}, {transform_indices = @transform_4, window_bounds = array<i64: 8, 512>}]} {
    %c0 = arith.constant 0 : index
    %c0_0 = arith.constant 0 : index
    %0 = vector.load %arg1[%c0, %c0_0] : memref<8x128xf32, #tpu.memory_space<vmem>>, vector<8x128xf32>
    %c0_1 = arith.constant 0 : index
    %c0_2 = arith.constant 0 : index
    %1 = vector.load %arg5[%c0_1, %c0_2] : memref<8x512xf32, #tpu.memory_space<vmem>>, vector<8x128xf32>
    tpu.vector_store %arg5[%c0_1, %c0_2], %0 {strides = array<i32>} : memref<8x512xf32, #tpu.memory_space<vmem>>, vector<8x128xf32>,
    %c0_3 = arith.constant 0 : index
    %c0_4 = arith.constant 0 : index
    %2 = vector.load %arg2[%c0_3, %c0_4] : memref<8x128xf32, #tpu.memory_space<vmem>>, vector<8x128xf32>
    %c0_5 = arith.constant 0 : index
    %c128 = arith.constant 128 : index
    %3 = vector.load %arg5[%c0_5, %c128] : memref<8x512xf32, #tpu.memory_space<vmem>>, vector<8x128xf32>
    tpu.vector_store %arg5[%c0_5, %c128], %2 {strides = array<i32>} : memref<8x512xf32, #tpu.memory_space<vmem>>, vector<8x128xf32>,
    %c0_6 = arith.constant 0 : index
    %c0_7 = arith.constant 0 : index
    %4 = vector.load %arg3[%c0_6, %c0_7] : memref<8x128xf32, #tpu.memory_space<vmem>>, vector<8x128xf32>
    %c0_8 = arith.constant 0 : index
    %c256 = arith.constant 256 : index
    %5 = vector.load %arg5[%c0_8, %c256] : memref<8x512xf32, #tpu.memory_space<vmem>>, vector<8x128xf32>
    tpu.vector_store %arg5[%c0_8, %c256], %4 {strides = array<i32>} : memref<8x512xf32, #tpu.memory_space<vmem>>, vector<8x128xf32>,
    %c0_9 = arith.constant 0 : index
    %c0_10 = arith.constant 0 : index
    %6 = vector.load %arg4[%c0_9, %c0_10] : memref<8x128xf32, #tpu.memory_space<vmem>>, vector<8x128xf32>
    %c0_11 = arith.constant 0 : index
    %c384 = arith.constant 384 : index
    %7 = vector.load %arg5[%c0_11, %c384] : memref<8x512xf32, #tpu.memory_space<vmem>>, vector<8x128xf32>
    tpu.vector_store %arg5[%c0_11, %c384], %6 {strides = array<i32>} : memref<8x512xf32, #tpu.memory_space<vmem>>, vector<8x128xf32>,
    return
  }
  func.func @transform_0(%arg0: i32) -> (i32, i32) {
    %c0_i32 = arith.constant 0 : i32
    %c0_i32_0 = arith.constant 0 : i32
    return %arg0, %c0_i32 : i32, i32
  }
  func.func @transform_1(%arg0: i32) -> (i32, i32) {
    %c0_i32 = arith.constant 0 : i32
    %c0_i32_0 = arith.constant 0 : i32
    return %arg0, %c0_i32 : i32, i32
  }
  func.func @transform_2(%arg0: i32) -> (i32, i32) {
    %c0_i32 = arith.constant 0 : i32
    %c0_i32_0 = arith.constant 0 : i32
    return %arg0, %c0_i32 : i32, i32
  }
  func.func @transform_3(%arg0: i32) -> (i32, i32) {
    %c0_i32 = arith.constant 0 : i32
    %c0_i32_0 = arith.constant 0 : i32
    return %arg0, %c0_i32 : i32, i32
  }
  func.func @transform_4(%arg0: i32) -> (i32, i32) {
    %c0_i32 = arith.constant 0 : i32
    %c0_i32_0 = arith.constant 0 : i32
    return %arg0, %c0_i32 : i32, i32
  }
}

</mosaic_0001>

<bundles_post_ra>
// kernel: tpu_custom_call.1
= control target key start
LH: loop header
LB: loop body
LE: loop exit
PB: predicated region body
PF: predicated region fallthrough
CT: control target
= control target key end

     0   :  { %9 = vsyncpa [#allocation3], 0  ;;  %s248_s0 = inlined_call_operand.hbm [shape: f32[8,128], index: 0, kind: input, shape index: {}]   ;;  %s249_s1 = inlined_call_operand.hbm [shape: f32[8,128], index: 1, kind: input, shape index: {}]   ;;  %s250_s2 = inlined_call_operand.hbm [shape: f32[8,128], index: 2, kind: input, shape index: {}]   ;;  %s251_s3 = inlined_call_operand.hbm [shape: f32[8,128], index: 3, kind: input, shape index: {}]   ;;  %s252_s4 = inlined_call_operand.hbm [shape: f32[8,512], index: 4, kind: output, shape index: {}]  }
   0x1   :  { %10 = vsyncpa [#allocation6], 0 }
   0x2   :  { %11 = vsyncpa [#allocation9], 0 }
   0x3   :  { %12 = vsyncpa [#allocation4], 0  ;;  %s203_s15 = smov [#allocation5]   ;;  %s204_s17 = smov [#allocation2]  }
   0x4   :  { %s29_s16 = sshll.u32 %s203_s15, 4  ;;  %s19_s18 = sshll.u32 %s204_s17, 4  ;;  %s30_s16 = int_to_ptr.vmem [resolvable:$true] %s29_s16  ;;  %s20_s18 = int_to_ptr.vmem [resolvable:$true] %s19_s18 }
   0x5   :  { %s103_s19 = scalar_lea.vmem %s30_s16, 128  ;;  %p108_p1 = scmp.lt.s32.totalorder %s30_s16, %s30_s16 }
   0x6   :  { %p104_p0 = scmp.ne.s32.totalorder %s30_s16, %s103_s19  ;;  %p109_p2 = scmp.lt.s32.totalorder %s103_s19, %s103_s19 }
   0x8   :  { %p110_p3 = por %p109_p2, %p108_p1 }
   0xa   :  { %p111_p4 = pnand %p110_p3, %p104_p0 }
   0xc   :  { %114 = shalt.err (!%p111_p4)
}
   0xd   :  { %32 = dma.hbm_to_vmem [thread:$0]  %s249_s1, 128, %s30_s16, [#allocation6]  }
   0xe   :  { %s123_s22 = scalar_lea.vmem %s20_s18, 128  ;;  %p128_p6 = scmp.lt.s32.totalorder %s20_s18, %s20_s18 }
   0xf   :  { %p124_p5 = scmp.ne.s32.totalorder %s20_s18, %s123_s22  ;;  %p129_p7 = scmp.lt.s32.totalorder %s123_s22, %s123_s22 }
  0x11   :  { %p130_p8 = por %p129_p7, %p128_p6 }
  0x13   :  { %p131_p9 = pnand %p130_p8, %p124_p5 }
  0x15   :  { %134 = shalt.err (!%p131_p9)
}
  0x16   :  { %22 = dma.hbm_to_vmem [thread:$0]  %s248_s0, 128, %s20_s18, [#allocation3]  }
  0x17   :  { %s205_s25 = smov [#allocation7]   ;;  %s206_s27 = smov [#allocation8]  }
  0x18   :  { %s39_s26 = sshll.u32 %s205_s25, 4  ;;  %s49_s28 = sshll.u32 %s206_s27, 4  ;;  %s40_s26 = int_to_ptr.vmem [resolvable:$true] %s39_s26  ;;  %s50_s28 = int_to_ptr.vmem [resolvable:$true] %s49_s28 }
  0x19   :  { %s143_s29 = scalar_lea.vmem %s40_s26, 128  ;;  %p148_p11 = scmp.lt.s32.totalorder %s40_s26, %s40_s26 }
  0x1a   :  { %p144_p10 = scmp.ne.s32.totalorder %s40_s26, %s143_s29  ;;  %p149_p12 = scmp.lt.s32.totalorder %s143_s29, %s143_s29 }
  0x1c   :  { %p150_p13 = por %p149_p12, %p148_p11 }
  0x1e   :  { %p151_p0 = pnand %p150_p13, %p144_p10 }
  0x20   :  { %154 = shalt.err (!%p151_p0)
}
  0x21   :  { %42 = dma.hbm_to_vmem [thread:$0]  %s250_s2, 128, %s40_s26, [#allocation6]  }
  0x22   :  { %s163_s5 = scalar_lea.vmem %s50_s28, 128  ;;  %p168_p2 = scmp.lt.s32.totalorder %s50_s28, %s50_s28 }
  0x23   :  { %p164_p1 = scmp.ne.s32.totalorder %s50_s28, %s163_s5  ;;  %p169_p3 = scmp.lt.s32.totalorder %s163_s5, %s163_s5 }
  0x25   :  { %p170_p4 = por %p169_p3, %p168_p2 }
  0x27   :  { %p171_p5 = pnand %p170_p4, %p164_p1 }
  0x29   :  { %174 = shalt.err (!%p171_p5)
}
  0x2a   :  { %52 = dma.hbm_to_vmem [thread:$0]  %s251_s3, 128, %s50_s28, [#allocation9]  }
  0x2b   :  { %195 = dma.done.wait [#allocation3], 128  }
  0x2c   :  { %196 = vsyncadd [#allocation3], 4294967168 }
  0x2d   :  { %197 = dma.done.wait [#allocation6], 256  }
  0x2e   :  { %198 = vsyncadd [#allocation6], 4294967040 }
  0x2f   :  { %199 = dma.done.wait [#allocation9], 128  }
  0x30   :  { %200 = vsyncadd [#allocation9], 4294967168  ;;  %s207_s7 = smov [#allocation10]   ;;  %v65_v0 = vld [vmem:[#allocation2] sm:$0xff]  ;;  %v67_v1 = vld [vmem:[#allocation5] sm:$0xff] }
  0x31   :  { %s79_s8 = sshll.u32 %s207_s7, 4  ;;  %v69_v2 = vld [vmem:[#allocation7] sm:$0xff]  ;;  %66 = vst [vmem:[#allocation10] sm:$0xff] %v65_v0  ;;  %68 = vst [vmem:[#allocation10 + $0x8] sm:$0xff] %v67_v1  ;;  %v71_v3 = vld [vmem:[#allocation8] sm:$0xff]  ;;  %s80_s8 = int_to_ptr.vmem [resolvable:$true] %s79_s8 }
  0x32   :  { %70 = vst [vmem:[#allocation10 + $0x10] sm:$0xff] %v69_v2  ;;  %72 = vst [vmem:[#allocation10 + $0x18] sm:$0xff] %v71_v3  ;;  %s175_s2 = scalar_lea.vmem %s80_s8, 512  ;;  %p180_p7 = scmp.lt.s32.totalorder %s80_s8, %s80_s8 }
  0x33   :  { %p176_p6 = scmp.ne.s32.totalorder %s80_s8, %s175_s2  ;;  %p181_p8 = scmp.lt.s32.totalorder %s175_s2, %s175_s2 }
  0x35   :  { %p182_p9 = por %p181_p8, %p180_p7 }
  0x37   :  { %p183_p10 = pnand %p182_p9, %p176_p6 }
  0x39   :  { %186 = shalt.err (!%p183_p10)
}
  0x3a   :  { %82 = dma.vmem_to_hbm [thread:$0]  %s80_s8, 512, %s252_s4, [#allocation4]  }
  0x3b   :  { %201 = dma.done.wait [#allocation4], 512  }
  0x3c   :  { %202 = vsyncadd [#allocation4], 4294966784 }
  0x3d   :  { %86 = vsyncpa [#allocation3], 1 }
  0x3e   :  { %87 = vsyncpa [#allocation6], 1 }
  0x3f   :  { %88 = vsyncpa [#allocation9], 1 }
  0x40   :  { %89 = vsyncpa [#allocation4], 1 }

</bundles_post_ra>
